<compile_context>
chip_gen: v6e
topology: v6e:2x2x1
jax: 0.10.0
libtpu: 0.0.40
codegen_flags: <defaults>
</compile_context>

<pallas_src>
import math

import jax
import jax.numpy as jnp
from jax.experimental import pallas as pl
from jax.experimental.pallas import tpu as pltpu

HIDDEN = 256


def _coattention_kernel(x_ref, y_ref, wq_ref, bq_ref, wkv_ref, bkv_ref, o_ref):
    # x_ref: (Bt*Nq, q_dim) f32   y_ref: (Bt*Nk, kv_dim) f32
    # wq_ref: (q_dim, 256) bf16 (pre-scaled by 1/sqrt(256))   bq_ref: (1, 256) f32
    # wkv_ref: (kv_dim, 512) bf16 ([Wk^T | Wv^T])             bkv_ref: (1, 512) f32
    # o_ref: (Bt, Nq, 256) f32
    bt, nq, h = o_ref.shape
    mk = y_ref.shape[0]
    nk = mk // bt

    # ---- in-kernel bf16 cast (no extra HBM pass; Mosaic pads contraction) ----
    x2 = x_ref[...].astype(jnp.bfloat16)
    y2 = y_ref[...].astype(jnp.bfloat16)

    # ---- projections: one big MXU matmul each, f32 accumulate, f32 bias ----
    q = jnp.dot(x2, wq_ref[...], preferred_element_type=jnp.float32) + bq_ref[...]
    kv = jnp.dot(y2, wkv_ref[...], preferred_element_type=jnp.float32) + bkv_ref[...]

    # Cast early (halves intermediate store bytes), then split / batch-reshape.
    q3 = q.astype(jnp.bfloat16).reshape(bt, nq, h)
    kvb = kv.astype(jnp.bfloat16)
    k3 = kvb[:, :h].reshape(bt, nk, h)          # 128-aligned lane slices
    v3 = kvb[:, h:].reshape(bt, nk, h)

    # ---- scores (scale already folded into Wq/bq); contract last dims ----
    s = jax.lax.dot_general(
        q3, k3,
        dimension_numbers=(((2,), (2,)), ((0,), (0,))),
        preferred_element_type=jnp.float32,
    )                                            # (Bt, Nq, Nk) f32

    # ---- numerically-stable softmax over keys (f32, exact divide) ----
    s = s - jnp.max(s, axis=-1, keepdims=True)
    p = jnp.exp(s)
    p = p / jnp.sum(p, axis=-1, keepdims=True)

    # ---- weighted values: (Bt, Nq, H) f32 ----
    o_ref[...] = jax.lax.dot_general(
        p.astype(jnp.bfloat16), v3,
        dimension_numbers=(((2,), (1,)), ((0,), (0,))),
        preferred_element_type=jnp.float32,
    )


def prepare_params(params):
    """One-time weight preprocessing (do this OUTSIDE the hot call path):
    fold 1/sqrt(256) into Wq/bq, fuse Wk|Wv and bk|bv, cast weights to bf16."""
    wq, bq, wk, bk, wv, bv = params
    scale = 1.0 / math.sqrt(HIDDEN)
    wq_s = (wq * scale).astype(jnp.bfloat16)
    bq_s = (bq * scale).astype(jnp.float32)
    wkv = jnp.concatenate([wk, wv], axis=1).astype(jnp.bfloat16)
    bkv = jnp.concatenate([bk, bv], axis=1).astype(jnp.float32)
    return wq_s, bq_s, wkv, bkv


def _pick_batch_block(B, Nq, Nk, q_dim, kv_dim):
    """Largest divisor of B that (a) fits a ~24 MiB per-step working set,
    (b) reaches an MXU-filling M (Bt*Nq, Bt*Nk >= 256) where possible,
    (c) keeps >= 2 grid steps (two v7x TensorCores), and
    (d) keeps Bt*Nq / Bt*Nk sublane-aligned (multiple of 8) for the 2D tiles."""
    per_b = (
        2 * Nq * q_dim * 4          # x tile, double-buffered f32
        + 2 * Nk * kv_dim * 4       # y tile
        + 2 * Nq * HIDDEN * 4       # out tile
        + Nq * HIDDEN * 4           # q  (f32 intermediate)
        + Nk * 2 * HIDDEN * 4       # kv (f32 intermediate)
        + 2 * Nq * Nk * 4           # scores + probs
        + (Nq + 2 * Nk) * HIDDEN * 2  # bf16 q3/k3/v3
    )
    budget = 24 << 20
    vmem_cap = max(budget // per_b, 1)
    mxu_target = max(pl.cdiv(256, Nq), pl.cdiv(256, Nk))
    target = min(vmem_cap, mxu_target)
    target = min(target, max(B // 2, 1))        # keep >= 2 grid steps when B allows

    bt = None
    for cand in range(1, min(target, B) + 1):
        if B % cand == 0 and (cand * Nq) % 8 == 0 and (cand * Nk) % 8 == 0:
            bt = cand
    if bt is None:
        bt = B                                  # full-batch block == array dims (always legal)
    return bt


def co_attention(x, y, prepared, *, batch_block=None):
    """x: (B, Nq, q_dim) f32, y: (B, Nk, kv_dim) f32 -> (B, Nq, 256) f32.
    `prepared` = prepare_params(params)."""
    B, Nq, q_dim = x.shape
    By, Nk, kv_dim = y.shape
    assert By == B
    wq_s, bq_s, wkv, bkv = prepared

    Bt = batch_block if batch_block is not None else _pick_batch_block(
        B, Nq, Nk, q_dim, kv_dim)
    assert B % Bt == 0

    # Host-side flatten is free layout metadata; tiles arrive 2D -> no in-kernel
    # input reshape / sublane repack.
    xf = x.reshape(B * Nq, q_dim)
    yf = y.reshape(B * Nk, kv_dim)

    flops = 2 * B * (Nq * q_dim * HIDDEN
                     + Nk * kv_dim * 2 * HIDDEN
                     + 2 * Nq * Nk * HIDDEN)
    bytes_accessed = ((xf.size + yf.size) * 4
                      + (wq_s.size + wkv.size) * 2
                      + (bq_s.size + bkv.size) * 4
                      + B * Nq * HIDDEN * 4)
    cost = pl.CostEstimate(flops=flops,
                           transcendentals=B * Nq * Nk,
                           bytes_accessed=bytes_accessed)

    const = lambda *shape: pl.BlockSpec(shape, lambda b: (0,) * len(shape))

    # TODO(synk): for long sequences, add an Nq grid axis (flash-style over Nk);
    # on v7x the Nk tiling becomes necessary at ~half the v6e sequence length.
    return pl.pallas_call(
        _coattention_kernel,
        out_shape=jax.ShapeDtypeStruct((B, Nq, HIDDEN), jnp.float32),
        grid_spec=pltpu.PrefetchScalarGridSpec(
            num_scalar_prefetch=0,
            grid=(B // Bt,),
            in_specs=[
                pl.BlockSpec((Bt * Nq, q_dim), lambda b: (b, 0)),   # x (f32, natural width)
                pl.BlockSpec((Bt * Nk, kv_dim), lambda b: (b, 0)),  # y (f32, natural width)
                const(q_dim, HIDDEN),        # Wq^T * 1/sqrt(256)  (bf16)
                const(1, HIDDEN),            # bq  * 1/sqrt(256)   (f32)
                const(kv_dim, 2 * HIDDEN),   # [Wk^T | Wv^T]       (bf16)
                const(1, 2 * HIDDEN),        # [bk | bv]           (f32)
            ],
            out_specs=pl.BlockSpec((Bt, Nq, HIDDEN), lambda b: (b, 0, 0)),
        ),
        compiler_params=pltpu.CompilerParams(
            dimension_semantics=("parallel",),
            vmem_limit_bytes=32 << 20),
        cost_estimate=cost,
    )(xf, yf, wq_s, bq_s, wkv, bkv)


def init_params(key, q_dim, kv_dim):
    """nn.Linear-style init (uniform +/- 1/sqrt(fan_in)); weights stored
    transposed as (in_dim, hidden)."""
    ks = jax.random.split(key, 6)

    def linear(kw, kb, in_dim):
        bound = 1.0 / math.sqrt(in_dim)
        w = jax.random.uniform(kw, (in_dim, HIDDEN), jnp.float32, -bound, bound)
        b = jax.random.uniform(kb, (1, HIDDEN), jnp.float32, -bound, bound)
        return w, b

    wq, bq = linear(ks[0], ks[1], q_dim)
    wk, bk = linear(ks[2], ks[3], kv_dim)
    wv, bv = linear(ks[4], ks[5], kv_dim)
    return (wq, bq, wk, bk, wv, bv)


def _reference(x, y, params):
    wq, bq, wk, bk, wv, bv = params
    q = x @ wq + bq
    k = y @ wk + bk
    v = y @ wv + bv
    s = jax.nn.softmax(jnp.einsum("bqd,bkd->bqk", q, k) / math.sqrt(HIDDEN),
                       axis=-1)
    return jnp.einsum("bqk,bkd->bqd", s, v)


if __name__ == "__main__":
    key = jax.random.PRNGKey(0)
    k_x, k_y, k_p = jax.random.split(key, 3)

    B, Nq, Nk = 4, 8, 16
    q_dim, kv_dim = 32, 48

    x = jax.random.normal(k_x, (B, Nq, q_dim), jnp.float32)
    y = jax.random.normal(k_y, (B, Nk, kv_dim), jnp.float32)
    params = init_params(k_p, q_dim, kv_dim)
    prepared = prepare_params(params)          # one-time weight prep (not per call)

    out = co_attention(x, y, prepared)
    jax.block_until_ready(out)

    ref = _reference(x, y, params)
    assert out.shape == (B, Nq, HIDDEN)
    max_err = float(jnp.max(jnp.abs(out - ref)))
    # Exact softmax divide; remaining error is from bf16 matmul inputs only.
    assert jnp.allclose(out, ref, atol=3e-2, rtol=3e-2), (
        f"mismatch vs reference (max abs err {max_err})")

    print("KERNEL_OK")
</pallas_src>

<mosaic_0001>
module attributes {stable_mosaic.version = 11 : i64} {
  func.func @_coattention_kernel(%arg0: i32, %arg1: memref<16x32xf32, #tpu.memory_space<vmem>>, %arg2: memref<32x48xf32, #tpu.memory_space<vmem>>, %arg3: memref<32x256xbf16, #tpu.memory_space<vmem>>, %arg4: memref<1x256xf32, #tpu.memory_space<vmem>>, %arg5: memref<48x512xbf16, #tpu.memory_space<vmem>>, %arg6: memref<1x512xf32, #tpu.memory_space<vmem>>, %arg7: memref<2x8x256xf32, #tpu.memory_space<vmem>>) attributes {dimension_semantics = [#tpu.dimension_semantics<parallel>], iteration_bounds = array<i64: 2>, scalar_prefetch = 0 : i64, scratch_operands = 0 : i64, tpu.core_type = #tpu.core_type<tc>, window_params = [{transform_indices = @transform_0, window_bounds = array<i64: 16, 32>}, {transform_indices = @transform_1, window_bounds = array<i64: 32, 48>}, {pipeline_mode = #tpu.pipeline_mode<synchronous>, transform_indices = @transform_2, window_bounds = array<i64: 32, 256>}, {pipeline_mode = #tpu.pipeline_mode<synchronous>, transform_indices = @transform_3, window_bounds = array<i64: 1, 256>}, {pipeline_mode = #tpu.pipeline_mode<synchronous>, transform_indices = @transform_4, window_bounds = array<i64: 48, 512>}, {pipeline_mode = #tpu.pipeline_mode<synchronous>, transform_indices = @transform_5, window_bounds = array<i64: 1, 512>}, {transform_indices = @transform_6, window_bounds = array<i64: 2, 8, 256>}]} {
    %c0 = arith.constant 0 : index
    %c0_0 = arith.constant 0 : index
    %0 = vector.load %arg1[%c0, %c0_0] : memref<16x32xf32, #tpu.memory_space<vmem>>, vector<16x32xf32>
    %1 = arith.truncf %0 : vector<16x32xf32> to vector<16x32xbf16>
    %c0_1 = arith.constant 0 : index
    %c0_2 = arith.constant 0 : index
    %2 = vector.load %arg2[%c0_1, %c0_2] : memref<32x48xf32, #tpu.memory_space<vmem>>, vector<32x48xf32>
    %3 = arith.truncf %2 : vector<32x48xf32> to vector<32x48xbf16>
    %c0_3 = arith.constant 0 : index
    %c0_4 = arith.constant 0 : index
    %4 = vector.load %arg3[%c0_3, %c0_4] : memref<32x256xbf16, #tpu.memory_space<vmem>>, vector<32x256xbf16>
    %cst = arith.constant dense<0.000000e+00> : vector<16x256xf32>
    %5 = tpu.matmul %1, %4, %cst {dimension_numbers = #tpu.dot_dimension_numbers<[1], [0], [0], [1], [0, 0, 1, 1], [], []>} : vector<16x32xbf16>, vector<32x256xbf16>, vector<16x256xf32> -> vector<16x256xf32>
    %c0_5 = arith.constant 0 : index
    %c0_6 = arith.constant 0 : index
    %6 = vector.load %arg4[%c0_5, %c0_6] : memref<1x256xf32, #tpu.memory_space<vmem>>, vector<1x256xf32>
    %7 = vector.broadcast %6 : vector<1x256xf32> to vector<16x256xf32>
    %8 = arith.addf %5, %7 : vector<16x256xf32>
    %c0_7 = arith.constant 0 : index
    %c0_8 = arith.constant 0 : index
    %9 = vector.load %arg5[%c0_7, %c0_8] : memref<48x512xbf16, #tpu.memory_space<vmem>>, vector<48x512xbf16>
    %cst_9 = arith.constant dense<0.000000e+00> : vector<32x512xf32>
    %10 = tpu.matmul %3, %9, %cst_9 {dimension_numbers = #tpu.dot_dimension_numbers<[1], [0], [0], [1], [0, 0, 1, 1], [], []>} : vector<32x48xbf16>, vector<48x512xbf16>, vector<32x512xf32> -> vector<32x512xf32>
    %c0_10 = arith.constant 0 : index
    %c0_11 = arith.constant 0 : index
    %11 = vector.load %arg6[%c0_10, %c0_11] : memref<1x512xf32, #tpu.memory_space<vmem>>, vector<1x512xf32>
    %12 = vector.broadcast %11 : vector<1x512xf32> to vector<32x512xf32>
    %13 = arith.addf %10, %12 : vector<32x512xf32>
    %14 = arith.truncf %8 : vector<16x256xf32> to vector<16x256xbf16>
    %15 = vector.shape_cast %14 : vector<16x256xbf16> to vector<2x8x256xbf16>
    %16 = arith.truncf %13 : vector<32x512xf32> to vector<32x512xbf16>
    %17 = vector.extract_strided_slice %16 {offsets = [0, 0], sizes = [32, 256], strides = [1, 1]} : vector<32x512xbf16> to vector<32x256xbf16>
    %18 = vector.shape_cast %17 : vector<32x256xbf16> to vector<2x16x256xbf16>
    %19 = vector.extract_strided_slice %16 {offsets = [0, 256], sizes = [32, 256], strides = [1, 1]} : vector<32x512xbf16> to vector<32x256xbf16>
    %20 = vector.shape_cast %19 : vector<32x256xbf16> to vector<2x16x256xbf16>
    %cst_12 = arith.constant dense<0.000000e+00> : vector<2x8x16xf32>
    %21 = tpu.matmul %15, %18, %cst_12 {dimension_numbers = #tpu.dot_dimension_numbers<[2], [2], [1], [1], [0, 0, 0, 1, 1, 1], [0], [0]>} : vector<2x8x256xbf16>, vector<2x16x256xbf16>, vector<2x8x16xf32> -> vector<2x8x16xf32>
    %cst_13 = arith.constant dense<0xFF800000> : vector<2x8xf32>
    %22 = vector.multi_reduction <maximumf>, %21, %cst_13 [2] : vector<2x8x16xf32> to vector<2x8xf32>
    %23 = vector.shape_cast %22 : vector<2x8xf32> to vector<2x8x1xf32>
    %24 = vector.broadcast %23 : vector<2x8x1xf32> to vector<2x8x16xf32>
    %25 = arith.subf %21, %24 : vector<2x8x16xf32>
    %26 = math.exp %25 : vector<2x8x16xf32>
    %cst_14 = arith.constant dense<0.000000e+00> : vector<2x8xf32>
    %27 = vector.multi_reduction <add>, %26, %cst_14 [2] : vector<2x8x16xf32> to vector<2x8xf32>
    %28 = vector.shape_cast %27 : vector<2x8xf32> to vector<2x8x1xf32>
    %29 = vector.broadcast %28 : vector<2x8x1xf32> to vector<2x8x16xf32>
    %30 = arith.divf %26, %29 : vector<2x8x16xf32>
    %31 = arith.truncf %30 : vector<2x8x16xf32> to vector<2x8x16xbf16>
    %cst_15 = arith.constant dense<0.000000e+00> : vector<2x8x256xf32>
    %32 = tpu.matmul %31, %20, %cst_15 {dimension_numbers = #tpu.dot_dimension_numbers<[2], [1], [1], [2], [0, 0, 0, 1, 1, 2], [0], [0]>} : vector<2x8x16xbf16>, vector<2x16x256xbf16>, vector<2x8x256xf32> -> vector<2x8x256xf32>
    %c0_16 = arith.constant 0 : index
    %c0_17 = arith.constant 0 : index
    %c0_18 = arith.constant 0 : index
    %33 = vector.load %arg7[%c0_16, %c0_17, %c0_18] : memref<2x8x256xf32, #tpu.memory_space<vmem>>, vector<2x8x256xf32>
    tpu.vector_store %arg7[%c0_16, %c0_17, %c0_18], %32 {strides = array<i32>} : memref<2x8x256xf32, #tpu.memory_space<vmem>>, vector<2x8x256xf32>,
    return
  }
  func.func @transform_0(%arg0: i32) -> (i32, i32) {
    %c0_i32 = arith.constant 0 : i32
    %c0_i32_0 = arith.constant 0 : i32
    return %arg0, %c0_i32 : i32, i32
  }
  func.func @transform_1(%arg0: i32) -> (i32, i32) {
    %c0_i32 = arith.constant 0 : i32
    %c0_i32_0 = arith.constant 0 : i32
    return %arg0, %c0_i32 : i32, i32
  }
  func.func @transform_2(%arg0: i32) -> (i32, i32) {
    %c0_i32 = arith.constant 0 : i32
    %c0_i32_0 = arith.constant 0 : i32
    %c0_i32_1 = arith.constant 0 : i32
    return %c0_i32, %c0_i32_0 : i32, i32
  }
  func.func @transform_3(%arg0: i32) -> (i32, i32) {
    %c0_i32 = arith.constant 0 : i32
    %c0_i32_0 = arith.constant 0 : i32
    %c0_i32_1 = arith.constant 0 : i32
    return %c0_i32, %c0_i32_0 : i32, i32
  }
  func.func @transform_4(%arg0: i32) -> (i32, i32) {
    %c0_i32 = arith.constant 0 : i32
    %c0_i32_0 = arith.constant 0 : i32
    %c0_i32_1 = arith.constant 0 : i32
    return %c0_i32, %c0_i32_0 : i32, i32
  }
  func.func @transform_5(%arg0: i32) -> (i32, i32) {
    %c0_i32 = arith.constant 0 : i32
    %c0_i32_0 = arith.constant 0 : i32
    %c0_i32_1 = arith.constant 0 : i32
    return %c0_i32, %c0_i32_0 : i32, i32
  }
  func.func @transform_6(%arg0: i32) -> (i32, i32, i32) {
    %c0_i32 = arith.constant 0 : i32
    %c0_i32_0 = arith.constant 0 : i32
    %c0_i32_1 = arith.constant 0 : i32
    return %arg0, %c0_i32, %c0_i32_0 : i32, i32, i32
  }
}

</mosaic_0001>

<bundles_post_ra>
// kernel: tpu_custom_call.1
= control target key start
LH: loop header
LB: loop body
LE: loop exit
PB: predicated region body
PF: predicated region fallthrough
CT: control target
= control target key end

     0   :  { %11 = vsyncpa [#allocation3], 0  ;;  %s1505_s0 = inlined_call_operand.hbm [shape: f32[32,32], index: 0, kind: input, shape index: {}]   ;;  %s1506_s1 = inlined_call_operand.vmem [shape: f32[64,48], index: 1, kind: input, shape index: {}]   ;;  %s1507_s2 = inlined_call_operand.hbm [shape: bf16[32,256], index: 2, kind: input, shape index: {}]   ;;  %s1508_s3 = inlined_call_operand.vmem [shape: f32[1,256], index: 3, kind: input, shape index: {}]   ;;  %s1509_s4 = inlined_call_operand.vmem [shape: bf16[48,512], index: 4, kind: input, shape index: {}]   ;;  %s1510_s5 = inlined_call_operand.vmem [shape: f32[1,512], index: 5, kind: input, shape index: {}]   ;;  %s1511_s6 = inlined_call_operand.hbm [shape: f32[4,8,256], index: 6, kind: output, shape index: {}]  }
   0x1   :  { %13 = vsyncpa [#allocation3 + $0x1], 0 }
   0x2   :  { %14 = vsyncpa [#allocation6], 0 }
   0x3   :  { %15 = vsyncpa [#allocation4], 0 }
   0x4   :  { %17 = vsyncpa [#allocation4 + $0x1], 0  ;;  %s1254_s21 = smov 0   ;;  %s1256_s22 = smov 0  }
   0x5   :  { %s1258_s23 = smov 0   ;;  %s1260_s24 = smov 0  }
   0x6 LB: > { %s1275_s25 = sadd.s32 4294967295, %s1209_s24   ;;  %s940_s26 = sadd.s32 4294967294, %s1209_s24   ;;  %s1209_s24 = sphi %s1260_s24, %s1537_s24   ;;  %s1205_s23 = sphi %s1258_s23, %s1536_s23   ;;  %s1201_s22 = sphi %s1256_s22, %s1535_s22   ;;  %s1197_s21 = sphi %s1254_s21, %s1534_s21  }
   0x7   : > { %p43_p0 = scmp.ne.s32.totalorder %s1201_s22, %s1197_s21  ;;  %p1512_p1 = scmp.eq.s32.totalorder %s1275_s25, 0 }
   0x8   : > { %p183_p3 = scmp.eq.s32.totalorder %s940_s26, 1  ;;  %p941_p5 = scmp.ge.s32.totalorder %s1209_s24, 1 }
   0x9   : > { %p1284_p4 = por %p1512_p1, %p43_p0  ;;  %p190_p7 = scmp.lt.s32.totalorder %s1209_s24, 3 }
   0xa   : > { %p1289_p6 = por %p183_p3, %p43_p0  ;;  %s1211_s30 = smov [#allocation5]  }
   0xb   : > { %s1518_s27 = scalar_select %p1284_p4, 1, 0 }
   0xc   : > { %s1519_s28 = scalar_select %p1289_p6, 1, 0 }
   0xd   : > { %p1294_p8 = pnand %p941_p5, %p190_p7  ;;  %s202_s7 = sshll.u32 %s1211_s30, 4  ;;  %s203_s7 = int_to_ptr.vmem [resolvable:$true] %s202_s7 }
   0xe   : > { %s1308_s9 = sadd.s32 1, %s1209_s24   ;;  %s30_s10 = sadd.s32 1, %s1205_s23 }
   0xf   : > { %s1520_s29 = scalar_select %p1294_p8, 1, 0 }
  0x10   : > { %p1001_p9 = pneg %p1294_p8  ;;  %s27_s11 = ssub.s32 %s1209_s24, %s1308_s9 }
  0x11   : > { %s1098_s12 = scalar_lea.vmem %s203_s7, 512  ;;  %p1106_p5 = scmp.lt.s32.totalorder %s203_s7, %s203_s7 }
  0x12   : > { %p1303_p11 = pnand %p1001_p9, %p1512_p1  ;;  %p1099_p13 = scmp.ne.s32.totalorder %s203_s7, %s1098_s12 }
  0x13   : > { %p1107_p7 = scmp.lt.s32.totalorder %s1098_s12, %s1098_s12 }
  0x14   : > { %p1089_p12 = pneg %p1303_p11 }
  0x15   : > { %p1108_p10 = por %p1107_p7, %p1106_p5 }
  0x16   : > { %p1101_p0 = pnand %p1099_p13, %p1089_p12 }
  0x18   : > { %p1102_p3 = pneg %p1101_p0 }
  0x1a   : > { %p1109_p2 = pnand %p1108_p10, %p1102_p3 }
  0x1c   : > { %1112 = shalt.err (!%p1109_p2)
}
  0x1d   : > { %s1513_s13 = smov 128   ;;  %s1514_s14 = smov 8  }
  0x1e   : > { %1004 = dma.hbm_to_vmem [thread:$0]  (!%p1303_p11), %s1507_s2, 512, %s203_s7, [#allocation6], %s1513_s13, %s1513_s13, %s1514_s14  }
  0x1f   : > { %p28_p2 = scmp.eq.s32.totalorder %s27_s11, 0  ;;  %p37_p9 = scmp.ne.s32.totalorder %s1205_s23, %s1201_s22 }
  0x20   : > { %p38_p10 = scmp.eq.s32.totalorder %s1209_s24, 0  ;;  %p1014_p12 = scmp.lt.s32.totalorder %s1209_s24, 2 }
  0x21   : > { %s1328_s17 = scalar_select %p28_p2, %s1205_s23, %s30_s10  }
  0x22   : > { %p39_p13 = por %p38_p10, %p37_p9  ;;  %p1522_p0 = scmp.eq.s32.totalorder %s1275_s25, 1 }
  0x23   : > { %s225_s19 = sand.u32 1, %s1205_s23   ;;  %s986_s20 = sshll.u32 %s1209_s24, 8 }
  0x24   : > { %p1332_p3 = por %p1522_p0, %p37_p9  ;;  %s944_s26 = sshll.u32 %s225_s19, 4 }
  0x25   : > { %s1341_s12 = scalar_lea.hbm %s1505_s0, %s986_s20  ;;  %s229_s7 = scalar_lea.vmem [#allocation2], %s944_s26 }
  0x26   : > { %s1523_s18 = scalar_select %p1332_p3, 1, 0 }
  0x27   : > { %s236_s10 = sshll.u32 %s229_s7, 4  ;;  %p1343_p11 = pnand %p1014_p12, %p39_p13  ;;  %s1347_s10 = int_to_ptr.vmem [resolvable:$true] %s236_s10 }
  0x28   : > { %s1349_s15 = scalar_lea.sflag [#allocation3], %s225_s19  ;;  %s1113_s16 = scalar_lea.hbm %s1341_s12, 256 }
  0x29   : > { %p1114_p5 = scmp.ne.s32.totalorder %s1341_s12, %s1113_s16  ;;  %p1115_p7 = pneg %p1343_p11 }
  0x2a   : > { %s1118_s26 = scalar_lea.hbm %s1505_s0, 512  ;;  %p1119_p10 = scmp.lt.s32.totalorder %s1341_s12, %s1505_s0 }
  0x2b   : > { %p1116_p2 = pnand %p1115_p7, %p1114_p5  ;;  %p1120_p12 = scmp.lt.s32.totalorder %s1118_s26, %s1113_s16 }
  0x2d   : > { %p1117_p9 = pneg %p1116_p2  ;;  %p1121_p13 = por %p1120_p12, %p1119_p10 }
  0x2f   : > { %p1122_p0 = pnand %p1121_p13, %p1117_p9 }
  0x31   : > { %1125 = shalt.err (!%p1122_p0)
}
  0x32   : > { %s1126_s19 = scalar_lea.vmem %s1347_s10, 256  ;;  %s1214_s13 = smov [#allocation2]  }
  0x33   : > { %p1127_p1 = scmp.ne.s32.totalorder %s1347_s10, %s1126_s19  ;;  %s1131_s14 = sshll.u32 %s1214_s13, 4  ;;  %s1132_s14 = int_to_ptr.vmem [resolvable:$false] %s1131_s14 }
  0x34   : > { %s1133_s20 = scalar_lea.vmem %s1132_s14, 512  ;;  %p1134_p2 = scmp.lt.s32.totalorder %s1347_s10, %s1132_s14 }
  0x35   : > { %p1129_p6 = pnand %p1127_p1, %p1115_p7  ;;  %p1135_p3 = scmp.lt.s32.totalorder %s1133_s20, %s1126_s19 }
  0x37   : > { %p1130_p5 = pneg %p1129_p6  ;;  %p1136_p4 = por %p1135_p3, %p1134_p2 }
  0x39   : > { %p1137_p8 = pnand %p1136_p4, %p1130_p5 }
  0x3b   : > { %1140 = shalt.err (!%p1137_p8)
}
  0x3c   : > { %s1525_s16 = smov 8   ;;  %s1526_s30 = smov 128  }
  0x3d   : > { %1008 = dma.hbm_to_vmem [thread:$0]  (!%p1343_p11), %s1341_s12, 256, %s1347_s10, %s1349_s15, %s1526_s30, %s1526_s30, %s1525_s16  }
  0x3e   : > { %p1527_p1 = scmp.ne.s32.totalorder %s1520_s29, 0 }
  0x3f   : > { %s1376_s13 = sand.u32 (!%p1527_p1), 1, %s1201_s22   ;;  %p1528_p4 = scmp.ne.s32.totalorder (!%p1527_p1), %s1518_s27, 0 }
  0x40   : > { %257 = sbr.rel (%p1527_p1) target bundleno = 1023 (0x3ff), region = 44  ;;  %s948_s14 = sshll.u32 (!%p1527_p1), %s1376_s13, 4 }
  0x41   : > { %s260_s26 = scalar_lea.sflag (!%p1527_p1), [#allocation3], %s1376_s13  ;;  %s1380_s8 = scalar_lea.vmem (!%p1527_p1), [#allocation2], %s948_s14 }
  0x45   : > { %1184 = dma.done.wait (%p1528_p4), %s260_s26, 256  }
  0x46   : > { %1186 = vsyncadd (%p1528_p4), %s260_s26, 4294967040  ;;  %p1529_p6 = scmp.eq.s32.totalorder %s1275_s25, 0 }
  0x48   : > { %1188 = dma.done.wait (%p1529_p6), [#allocation6], 512   ;;  %p1530_p8 = pmov %p1529_p6 }
  0x49   : > { %s951_s29 = sshll.u32 %s1275_s25, 2  ;;  %v1215_v0 = vmov 0   ;;  %v1055_v1 = vld [vmem:[%s1509_s4 + $0x44] ss:$16 sps:$4 sm:$0xff]   ;;  %v1057_v2 = vld [vmem:[%s1509_s4 + $0x40] ss:$16 sps:$4 sm:$0xff]   ;;  %v325_v26 = vlaneseq }
  0x4a   : > { %1190 = vsyncadd (%p1530_p8), [#allocation6], 4294966784  ;;  %535 = vmatprep.mubr.bf16.mxu1 %v1215_v0  ;;  %p303_p3 = scmp.lt.s32.totalorder %s951_s29, 7  ;;  %391 = vmatprep.mubr.bf16.mxu0 %v1215_v0  ;;  %v1058_v3 = vld [vmem:[%s1509_s4 + $0x24] ss:$16 sps:$4 sm:$0xff]   ;;  %v311_v14 = vld [vmem:[%s1380_s8 + $0x8] sm:$0xff] }
  0x4b   : > { %513 = vmatprep.subr.bf16.mxu1 %v1055_v1  ;;  %v1060_v4 = vld [vmem:[%s1509_s4 + $0x20] ss:$16 sps:$4 sm:$0xff]   ;;  %v1061_v5 = vld [vmem:[%s1509_s4 + $0x4] ss:$16 sps:$4 sm:$0xff]   ;;  %v1072_v15 = vld [vmem:[%s1509_s4 + $0x4c] ss:$16 sps:$4 sm:$0xff]  }
  0x4c   : > { %s1539_s29 = smov (!%p303_p3, %s951_s29), 7  ;;  %514 = vmatpush1.bf16.msra.mxu1 %v1057_v2  ;;  %v1063_v6 = vld [vmem:[%s1509_s4] ss:$16 sps:$4 sm:$0xff]   ;;  %v1064_v7 = vld [vmem:[#allocation5 + $0x14] ss:$8 sps:$4 sm:$0xff]   ;;  %vm496_vm0 = vcmask 392192  }
  0x4d   : > { %s952_s15 = sshll.u32 %s1539_s29, 3  ;;  %515 = vmatprep.subr.bf16.mxu1 %v1058_v3  ;;  %v1066_v8 = vld [vmem:[#allocation5 + $0x10] ss:$8 sps:$4 sm:$0xff]   ;;  %v1067_v9 = vld [vmem:[#allocation5 + $0x4] ss:$8 sps:$4 sm:$0xff]   ;;  %371 = vmatprep.subr.bf16.mxu0 %v1064_v7  ;;  %vm355_vm1 = vcmask 261120  }
  0x4e   : > { %s306_s29 = scalar_lea.vmem %s1506_s1, %s952_s15  ;;  %v1069_v12 = vld [vmem:[#allocation5] ss:$8 sps:$4 sm:$0xff]   ;;  %372 = vmatpush1.bf16.msra.mxu0 %v1066_v8  ;;  %v1075_v22 = vld [vmem:[%s1509_s4 + $0x2c] ss:$16 sps:$4 sm:$0xff]   ;;  %v326_v27 = vshrl.u32 %v325_v26, 7  ;;  %vm713_vm2 = vcmask 130048  }
  0x4f   : > { %v313_v10 = vld [vmem:[%s306_s29] sm:$0xff]  ;;  %v314_v11 = vld [vmem:[%s306_s29 + $0x8] sm:$0xff]  ;;  %373 = vmatprep.subr.bf16.mxu0 %v1067_v9  ;;  %v315_v19 = vld [vmem:[%s306_s29 + $0x10] sm:$0xff]  ;;  %s950_s15 = sshll.u32 %s1376_s13, 5  ;;  %s992_s20 = sshll.u32 %s1275_s25, 9 }
  0x50   : > { %516 = vmatpush1.bf16.msra.mxu1 %v1060_v4  ;;  %v310_v13 = vld [vmem:[%s1380_s8] sm:$0xff]  ;;  %v317_v16 = vpack.c.bf16 %v314_v11, %v313_v10  ;;  %v1070_v18 = vld [vmem:[%s1509_s4 + $0x48] ss:$16 sps:$4 sm:$0xff]   ;;  %v1078_v24 = vld [vmem:[%s1509_s4 + $0xc] ss:$16 sps:$4 sm:$0xff]   ;;  %v331_v29 = vsub.s32 1, %v326_v27  ;;  %s1462_s14 = scalar_lea.hbm %s1511_s6, %s992_s20 }
  0x51   : > { %517 = vmatprep.subr.bf16.mxu1 %v1061_v5  ;;  %v312_v17 = vpack.c.bf16 %v311_v14, %v310_v13  ;;  %v316_v20 = vld [vmem:[%s306_s29 + $0x18] sm:$0xff]  ;;  %v323_v28 = vld [vmem:[%s1508_s3] sm:$0x3]  ;;  %v327_v30 = vsub.s32 0, %v326_v27  ;;  %v426_v5 = vsub.s32 2, %v326_v27  ;;  %s300_s19 = scalar_lea.vmem [#allocation7], %s950_s15 }
  0x52   : > { %374 = vmatpush1.bf16.msra.mxu0 %v1069_v12  ;;  %v318_v21 = vpack.c.bf16 %v316_v20, %v315_v19  ;;  %v1073_v23 = vld [vmem:[%s1509_s4 + $0x28] ss:$16 sps:$4 sm:$0xff]   ;;  %v332_v32 = vrot.slane %v323_v28, %v331_v29  ;;  %v414_v33 = vld [vmem:[%s1510_s5] sm:$0xf]  ;;  %s845_s8 = sshll.u32 %s300_s19, 4  ;;  %s831_s26 = scalar_lea.sflag [#allocation4], %s1376_s13  ;;  %s1457_s8 = int_to_ptr.vmem [resolvable:$true] %s845_s8 }
  0x53   : > { %566 = vmatprep.subr.bf16.mxu0 %v1072_v15  ;;  %v1076_v25 = vld [vmem:[%s1509_s4 + $0x8] ss:$16 sps:$4 sm:$0xff]   ;;  %v423_v36 = vrot.slane %v414_v33, %v331_v29  ;;  %v419_v38 = vrot.slane %v414_v33, %v327_v30  ;;  %v328_v47 = vrot.slane %v323_v28, %v327_v30  ;;  %v427_v7 = vrot.slane %v414_v33, %v426_v5  ;;  %s1141_s12 = scalar_lea.vmem %s1457_s8, 512  ;;  %p1531_p7 = scmp.ne.s32.totalorder %s1523_s18, 0 }
  0x54   : > { %518 = vmatpush1.bf16.msra.mxu1 %v1063_v6  ;;  %v430_v6 = vsub.s32 3, %v326_v27  ;;  %p1142_p11 = scmp.ne.s32.totalorder %s1457_s8, %s1141_s12  ;;  %s1216_s25 = smov [#allocation7]  }
  0x55   : > { %957 = vmatmul.mubr.msk.bf16.vlgmr.msra.gmra.mxu0 %vm355_vm1, %v312_v17  ;;  %s1145_s29 = sshll.u32 %s1216_s25, 4  ;;  %s1146_s29 = int_to_ptr.vmem [resolvable:$false] %s1145_s29 }
  0x56   : > { %567 = vmatpush1.bf16.msra.mxu0 %v1070_v18  ;;  %588 = vmatprep.mubr.bf16.mxu0 %v1215_v0  ;;  %v431_v9 = vrot.slane %v414_v33, %v430_v6  ;;  %p1143_p9 = pnand %p1142_p11, %p1531_p7  ;;  %s1147_s10 = scalar_lea.vmem %s1146_s29, 1024 }
  0x57   : > { %970 = vmatmul.mubr.msk.bf16.vlgmr.msra.gmra.mxu1 %vm496_vm0, %v317_v16  ;;  %568 = vmatprep.subr.bf16.mxu0 %v1075_v22  ;;  %p1148_p12 = scmp.lt.s32.totalorder %s1457_s8, %s1146_s29  ;;  %p1149_p13 = scmp.lt.s32.totalorder %s1147_s10, %s1141_s12 }
  0x58   : > { %545 = vmatprep.mubr.bf16.mxu1 %v1215_v0  ;;  %p1144_p10 = pneg %p1143_p9 }
  0x59   : > { %p1150_p0 = por %p1149_p13, %p1148_p12 }
  0x5a   : > { %569 = vmatpush1.bf16.msra.mxu0 %v1073_v23 }
  0x5b   : > { %570 = vmatprep.subr.bf16.mxu0 %v1078_v24  ;;  %p1151_p5 = pnand %p1150_p0, %p1144_p10 }
  0x5e   : > { %571 = vmatpush1.bf16.msra.mxu0 %v1076_v25 }
  0x5f   : > { %971 = vmatmul.mubr.msk.bf16.gmra.mxu1 %vm496_vm0, %v318_v21 }
  0x61   : > { %972 = vmatmul.mubr.msk.bf16.vlgmr.msra.gmra.mxu0 %vm496_vm0, %v317_v16 }
  0x62   : > { %598 = vmatprep.mubr.bf16.mxu0 %v1215_v0 }
  0x69   : > { %973 = vmatmul.mubr.msk.bf16.gmra.mxu0 %vm496_vm0, %v318_v21 }
 0x115   : > { %v393_v34 = vpop.f32.mrf.mxu0 }
 0x116   : > { %v394_v56 = vadd.f32 %v393_v34, %v328_v47 }
 0x117   : > { %v537_v31 = vpop.f32.mrf.mxu1  ;;  %v395_v37 = vpop.f32.mrf.mxu0 }
 0x118   : > { %v396_v40 = vadd.f32 %v395_v37, %v332_v32  ;;  %v538_v49 = vadd.f32 %v537_v31, %v419_v38  ;;  %v987_v61 = vpack.c.bf16 %v394_v56, %v394_v56 }
 0x119   : > { %v539_v35 = vpop.f32.mrf.mxu1  ;;  %v397_v41 = vpop.f32.mrf.mxu0 }
 0x11a   : > { %v988_v44 = vpack.c.bf16 %v396_v40, %v396_v40  ;;  %v540_v45 = vadd.f32 %v539_v35, %v423_v36  ;;  %v398_v3 = vadd.f32 %v397_v41, %v328_v47 }
 0x11b   : > { %v541_v39 = vpop.f32.mrf.mxu1  ;;  %v399_v48 = vpop.f32.mrf.mxu0 }
 0x11c   : > { %v542_v42 = vadd.f32 %v541_v39, %v419_v38  ;;  %661 = vmatprep.mubr.bf16.mxu1 %v988_v44  ;;  %v400_v51 = vadd.f32 %v399_v48, %v332_v32  ;;  %v989_v4 = vpack.c.bf16 %v398_v3, %v398_v3 }
 0x11d   : > { %v543_v43 = vpop.f32.mrf.mxu1 }
 0x11e   : > { %v544_v46 = vadd.f32 %v543_v43, %v423_v36  ;;  %v617_v53 = vpack.c.bf16 %v542_v42, %v538_v49  ;;  %v990_v55 = vpack.c.bf16 %v400_v51, %v400_v51 }
 0x11f   : > { %v547_v50 = vpop.f32.mrf.mxu1 }
 0x120   : > { %v618_v52 = vpack.c.bf16 %v544_v46, %v540_v45  ;;  %705 = vmatprep.mubr.bf16.mxu0 %v990_v55  ;;  %v548_v63 = vadd.f32 %v547_v50, %v419_v38 }
 0x121   : > { %v549_v54 = vpop.f32.mrf.mxu1  ;;  %v590_v8 = vpop.f32.mrf.mxu0 }
 0x122   : > { %643 = vmatprep.subr.bf16.mxu1 %v618_v52  ;;  %v550_v60 = vadd.f32 %v549_v54, %v423_v36  ;;  %v591_v11 = vadd.f32 %v590_v8, %v427_v7 }
 0x123   : > { %v551_v57 = vpop.f32.mrf.mxu1  ;;  %644 = vmatpush1.bf16.xpose.msra.mxu1 %v617_v53  ;;  %v592_v10 = vpop.f32.mrf.mxu0 }
 0x124   : > { %v552_v58 = vadd.f32 %v551_v57, %v419_v38  ;;  %v593_v13 = vadd.f32 %v592_v10, %v431_v9 }
 0x125   : > { %v553_v59 = vpop.f32.mrf.mxu1  ;;  %v594_v12 = vpop.f32.mrf.mxu0 }
 0x126   : > { %v554_v62 = vadd.f32 %v553_v59, %v423_v36  ;;  %v621_v2 = vpack.c.bf16 %v552_v58, %v548_v63  ;;  %v595_v14 = vadd.f32 %v594_v12, %v427_v7 }
 0x127   : > { %v596_v15 = vpop.f32.mrf.mxu0 }
 0x128   : > { %v622_v1 = vpack.c.bf16 %v554_v62, %v550_v60  ;;  %v597_v16 = vadd.f32 %v596_v15, %v431_v9  ;;  %v619_v17 = vpack.c.bf16 %v595_v14, %v591_v11 }
 0x129   : > { %v600_v18 = vpop.f32.mrf.mxu0 }
 0x12a   : > { %662 = vmatmul.mubr.bf16.vlgmr.msra.gmra.mxu1 %v987_v61  ;;  %687 = vmatprep.subr.bf16.mxu0 %v622_v1  ;;  %v620_v19 = vpack.c.bf16 %v597_v16, %v593_v13 }
 0x12b   : > { %688 = vmatpush1.bf16.xpose.msra.mxu0 %v621_v2  ;;  %773 = vmatprep.mubr.bf16.mxu1 %v1215_v0  ;;  %v602_v20 = vpop.f32.mrf.mxu0 }
 0x12c   : > { %755 = vmatprep.subr.bf16.mxu1 %v620_v19  ;;  %v603_v23 = vadd.f32 %v602_v20, %v431_v9 }
 0x12d   : > { %v604_v21 = vpop.f32.mrf.mxu0  ;;  %756 = vmatpush1.bf16.msra.mxu1 %v619_v17 }
 0x12e   : > { %v605_v25 = vadd.f32 %v604_v21, %v427_v7 }
 0x12f   : > { %v606_v22 = vpop.f32.mrf.mxu0 }
 0x130   : > { %v607_v24 = vadd.f32 %v606_v22, %v431_v9 }
 0x132   : > { %706 = vmatmul.mubr.bf16.vlgmr.msra.gmra.mxu0 %v989_v4  ;;  %v624_v26 = vpack.c.bf16 %v607_v24, %v603_v23 }
 0x133   : > { %817 = vmatprep.mubr.bf16.mxu0 %v1215_v0  ;;  %v601_v0 = vadd.f32 %v600_v18, %v427_v7 }
 0x134   : > { %799 = vmatprep.subr.bf16.mxu0 %v624_v26 }
 0x135   : > { %v623_v27 = vpack.c.bf16 %v605_v25, %v601_v0 }
 0x137   : > { %800 = vmatpush1.bf16.msra.mxu0 %v623_v27 }
 0x1ea   : > { %v663_v28 = vpop.f32.mrf.mxu1 }
 0x1eb   : > { %v714_v29 = vsel %vm713_vm2, %v663_v28, -inf }
 0x1ec   : > { %715 = vmax.xlane.f32.xlu0 %v714_v29  ;;  %v665_v30 = vpop.f32.mrf.mxu1 }
 0x1ee   : > { %v666_v31 = vpop.f32.mrf.mxu1 }
 0x1f0   : > { %v667_v32 = vpop.f32.mrf.mxu1 }
 0x1f2   : > { %v707_v33 = vpop.f32.mrf.mxu0 }
 0x1f3   : > { %v717_v34 = vsel %vm713_vm2, %v707_v33, -inf }
 0x1f4   : > { %v709_v35 = vpop.f32.mrf.mxu0  ;;  %718 = vmax.xlane.f32.xlu0 %v717_v34 }
 0x1f6   : > { %v710_v36 = vpop.f32.mrf.mxu0 }
 0x1f8   : > { %v711_v37 = vpop.f32.mrf.mxu0 }
 0x275   : > { %v716_v38 = vpop.xlane.xlu0 %715 }
 0x276   : > { %v720_v39 = vsub.f32 %v663_v28, %v716_v38 }
 0x278   : > { %v722_v40 = vmul.f32 1.442695, %v720_v39 }
 0x27a   : > { %1079 = vpow2.f32 %v722_v40 }
 0x27d   : > { %v719_v41 = vpop.xlane.xlu0 %718 }
 0x27e   : > { %v721_v42 = vsub.f32 %v707_v33, %v719_v41 }
 0x280   : > { %v724_v43 = vmul.f32 1.442695, %v721_v42 }
 0x282   : > { %1081 = vpow2.f32 %v724_v43 }
 0x287   : > { %v1080_v44 = vpop.eup %1079 }
 0x288   : > { %v726_v45 = vsel %vm713_vm2, %v1080_v44, 0.0 }
 0x289   : > { %727 = vadd.xlane.f32.xlu1 %v726_v45 }
 0x28f   : > { %v1082_v46 = vpop.eup %1081 }
 0x290   : > { %v729_v47 = vsel %vm713_vm2, %v1082_v46, 0.0 }
 0x291   : > { %730 = vadd.xlane.f32.xlu1 %v729_v47 }
 0x312   : > { %v728_v48 = vpop.xlane.xlu1 %727 }
 0x313   : > { %1083 = vrcp.f32 %v728_v48 }
 0x31a   : > { %v731_v49 = vpop.xlane.xlu1 %730 }
 0x31b   : > { %1085 = vrcp.f32 %v731_v49 }
 0x320   : > { %v1084_v50 = vpop.eup %1083 }
 0x321   : > { %v733_v51 = vmul.f32 %v1084_v50, %v1080_v44 }
 0x323   : > { %v736_v52 = vpack.c.bf16 %v733_v51, %v733_v51 }
 0x325   : > { %978 = vmatmul.mubr.msk.bf16.vlgmr.msra.gmra.mxu1 %vm713_vm2, %v736_v52 }
 0x328   : > { %v1086_v53 = vpop.eup %1085 }
 0x329   : > { %v735_v54 = vmul.f32 %v1086_v53, %v1082_v46 }
 0x32b   : > { %v737_v55 = vpack.c.bf16 %v735_v54, %v735_v54 }
 0x32d   : > { %979 = vmatmul.mubr.msk.bf16.vlgmr.msra.gmra.mxu0 %vm713_vm2, %v737_v55 }
 0x3e5   : > { %v775_v56 = vpop.f32.mrf.mxu1 }
 0x3e6   : > { %826 = vst [vmem:[%s300_s19] sm:$0xff] %v775_v56 }
 0x3e7   : > { %v777_v57 = vpop.f32.mrf.mxu1 }
 0x3e8   : > { %827 = vst [vmem:[%s300_s19 + $0x8] sm:$0xff] %v777_v57 }
 0x3e9   : > { %v779_v58 = vpop.f32.mrf.mxu1 }
 0x3eb   : > { %v780_v59 = vpop.f32.mrf.mxu1 }
 0x3ed   : > { %v819_v60 = vpop.f32.mrf.mxu0 }
 0x3ee   : > { %828 = vst [vmem:[%s300_s19 + $0x10] sm:$0xff] %v819_v60 }
 0x3ef   : > { %v821_v61 = vpop.f32.mrf.mxu0 }
 0x3f0   : > { %829 = vst [vmem:[%s300_s19 + $0x18] sm:$0xff] %v821_v61 }
 0x3f1   : > { %v823_v62 = vpop.f32.mrf.mxu0 }
 0x3f2   : > { %1154 = shalt.err (!%p1151_p5)
}
 0x3f3   : > { %s1155_s27 = scalar_lea.hbm %s1462_s14, 512  ;;  %s1159_s15 = scalar_lea.hbm %s1511_s6, 1024 }
 0x3f4   : > { %p1156_p2 = scmp.ne.s32.totalorder %s1462_s14, %s1155_s27  ;;  %p1160_p6 = scmp.lt.s32.totalorder %s1462_s14, %s1511_s6 }
 0x3f5   : > { %p1161_p8 = scmp.lt.s32.totalorder %s1159_s15, %s1155_s27 }
 0x3f6   : > { %p1157_p1 = pnand %p1156_p2, %p1531_p7 }
 0x3f7   : > { %p1162_p3 = por %p1161_p8, %p1160_p6 }
 0x3f8   : > { %p1158_p4 = pneg %p1157_p1 }
 0x3fa   : > { %p1163_p11 = pnand %p1162_p3, %p1158_p4 }
 0x3fc   : > { %1166 = shalt.err (!%p1163_p11)
}
 0x3fd   : > { %s1217_s16 = smov 256   ;;  %s1218_s30 = smov 16   ;;  %v824_v63 = vpop.f32.mrf.mxu0 }
 0x3fe   : > { %999 = dma.vmem_to_hbm [thread:$0]  (%p1531_p7), %s1457_s8, 512, %s1462_s14, %s831_s26, %s1217_s16, %s1217_s16, %s1218_s30  }
 0x3ff PF: > { %s860_s12 = sand.u32 1, %s1197_s21   ;;  %p1532_p9 = scmp.ne.s32.totalorder %s1519_s28, 0 }
 0x400   : > { %p1533_p10 = scmp.ge.s32.totalorder %s1209_s24, 2  ;;  %s861_s25 = scalar_lea.sflag [#allocation4], %s860_s12 }
 0x402   : > { %p1010_p12 = pnand %p1533_p10, %p1532_p9 }
 0x404   : > { %p1011_p13 = pneg %p1010_p12 }
 0x406   : > { %1192 = dma.done.wait (%p1011_p13), %s861_s25, 512  }
 0x407   : > { %1194 = vsyncadd (%p1011_p13), %s861_s25, 4294966784  ;;  %p20_p0 = scmp.ge.s32.totalorder %s1308_s9, 4   ;;  %s1534_s21 = smov %s1201_s22 }
 0x408   : > { %s1535_s22 = smov %s1205_s23  ;;  %s1536_s23 = smov %s1328_s17 }
 0x409   : > { %s1537_s24 = smov %s1308_s9  ;;  %22 = sbr.rel (!%p20_p0) target bundleno = 6 (0x6), region = 96 }
 0x40e   :  { %866 = vsyncpa [#allocation3], 1 }
 0x40f   :  { %868 = vsyncpa [#allocation3 + $0x1], 1 }
 0x410   :  { %869 = vsyncpa [#allocation6], 1 }
 0x411   :  { %870 = vsyncpa [#allocation4], 1 }
 0x412   :  { %872 = vsyncpa [#allocation4 + $0x1], 1 }

</bundles_post_ra>
